<compile_context>
chip_gen: v7x
topology: tpu7x:2x2x1
jax: 0.10.0
libtpu: 0.0.40
codegen_flags: <defaults>
</compile_context>

<pallas_src>
import math

import jax
import jax.numpy as jnp
from jax.experimental import pallas as pl
from jax.experimental.pallas import tpu as pltpu


# ----------------------------------------------------------------------------
# Kernel bodies
# ----------------------------------------------------------------------------
def _make_kernel(use_scratch, precision):
    """Build the kernel body.

    use_scratch=False: f32 output -> accumulate directly into the resident
    output block (it stays in VMEM across the K grid axis).
    use_scratch=True : non-f32 output -> accumulate into an f32 VMEM scratch
    and cast in the epilogue.
    """
    if use_scratch:
        def kernel(x_ref, wt_ref, scale_ref, b_ref, o_ref, acc_ref):
            k = pl.program_id(2)

            @pl.when(k == 0)
            def _init():
                acc_ref[...] = jnp.zeros_like(acc_ref)

            acc_ref[...] += jnp.dot(x_ref[...], wt_ref[...],
                                    preferred_element_type=jnp.float32,
                                    precision=precision)

            @pl.when(k == pl.num_programs(2) - 1)
            def _finalize():
                o_ref[...] = (acc_ref[...] * scale_ref[...]
                              + b_ref[...]).astype(o_ref.dtype)
    else:
        def kernel(x_ref, wt_ref, scale_ref, b_ref, o_ref):
            k = pl.program_id(2)

            @pl.when(k == 0)
            def _init():
                o_ref[...] = jnp.zeros_like(o_ref)

            o_ref[...] += jnp.dot(x_ref[...], wt_ref[...],
                                  preferred_element_type=jnp.float32,
                                  precision=precision)

            @pl.when(k == pl.num_programs(2) - 1)
            def _finalize():
                o_ref[...] = o_ref[...] * scale_ref[...] + b_ref[...]

    return kernel


# ----------------------------------------------------------------------------
# Tiling helpers
# ----------------------------------------------------------------------------
def _cdiv(a, b):
    return -(-a // b)


def _round_up(x, m):
    return _cdiv(x, m) * m


def _balanced_tile(dim, preferred, align):
    """Aligned tile <= preferred, balanced so the last block isn't mostly pad."""
    aligned = _round_up(max(dim, 1), align)
    if aligned <= preferred:
        return aligned
    nblocks = _cdiv(dim, preferred)
    return _round_up(_cdiv(dim, nblocks), align)


def _pick_tn(n, preferred=512):
    """Lane-dense N tile; prefer >=2 N blocks (v7x has 2 TensorCores) when the
    split costs no extra padding."""
    tn = _balanced_tile(n, preferred, 128)
    np0 = _round_up(n, tn)
    if np0 // tn >= 2 or np0 <= 128:
        return tn
    best = tn
    cand = 128
    while cand * 2 <= np0:
        if np0 % cand == 0:
            best = cand
        cand += 128
    return best


# ----------------------------------------------------------------------------
# Parameter preparation (hoisted out of the per-call path)
# ----------------------------------------------------------------------------
def prepare_lipschitz_linear(weight, bias, c, *, tn=None, tk=None,
                             compute_dtype=None):
    """One-time preprocessing of the LipschitzLinear parameters.

    Computes scale = min(softplus(c)/|W|.sum(1), 1) in f32, lays W out as
    W^T (K, N), and zero-pads everything to lane/sublane-aligned tile
    multiples exactly once, so the forward pass streams parameters straight
    into the kernel with no per-call transpose / pad / reduction over W.
    Re-run after each parameter update; for inference it is a one-time cost.
    """
    out_features, in_features = weight.shape

    w32 = weight.astype(jnp.float32)
    lipc = jax.nn.softplus(c.astype(jnp.float32).reshape(()))
    row_sum = jnp.sum(jnp.abs(w32), axis=1)                    # (N,)
    scale = jnp.minimum(lipc / row_sum, 1.0)                   # (N,)

    tk = tk or _balanced_tile(in_features, 1024, 128)
    tn = tn or _pick_tn(out_features)
    kp = _round_up(in_features, tk)
    npad = _round_up(out_features, tn)

    wt = weight.T
    if compute_dtype is not None:
        wt = wt.astype(compute_dtype)
    if (kp, npad) != (in_features, out_features):
        wt = jnp.pad(wt, ((0, kp - in_features), (0, npad - out_features)))
    scale_p = jnp.pad(scale.reshape(1, -1),
                      ((0, 0), (0, npad - out_features)))
    bias_p = jnp.pad(bias.astype(jnp.float32).reshape(1, -1),
                     ((0, 0), (0, npad - out_features)))

    return dict(wt=wt, scale=scale_p, bias=bias_p,
                in_features=in_features, out_features=out_features,
                tn=tn, tk=tk)


# ----------------------------------------------------------------------------
# Forward pass
# ----------------------------------------------------------------------------
def lipschitz_linear_prepared(x, prepared, *, tm=None):
    """y = x @ (W * scale[:, None]).T + bias, with scale/W^T pre-packed."""
    wt, scale, bias = prepared["wt"], prepared["scale"], prepared["bias"]
    K, N = prepared["in_features"], prepared["out_features"]
    tn, tk = prepared["tn"], prepared["tk"]
    kp, npad = wt.shape

    orig_shape = x.shape
    out_dtype = x.dtype
    x2d = x.reshape(-1, K)
    if x2d.dtype != wt.dtype:
        x2d = x2d.astype(wt.dtype)   # e.g. f32 activations with bf16 weights
    M = x2d.shape[0]

    tm = tm or _balanced_tile(M, 512, 8)
    mp = _round_up(M, tm)
    if (mp, kp) != (M, K):
        x2d = jnp.pad(x2d, ((0, mp - M), (0, kp - K)))

    grid = (mp // tm, npad // tn, kp // tk)

    use_scratch = jnp.dtype(out_dtype) != jnp.dtype(jnp.float32)
    operands_f32 = (x2d.dtype == jnp.float32) and (wt.dtype == jnp.float32)
    precision = jax.lax.Precision.HIGHEST if operands_f32 else None
    kernel = _make_kernel(use_scratch, precision)

    # Small-M, multi-K shapes are DMA-latency prone: deepen the input pipeline.
    deep_pipe = grid[0] == 1 and grid[2] >= 2
    stream_kw = {"pipeline_mode": pl.Buffered(3)} if deep_pipe else {}

    # Size the scoped VMEM budget to the real pipelined footprint (raises the
    # 16 MiB v5e default; stays well under v7x's 64 MiB physical VMEM).
    n_buf = 3 if deep_pipe else 2
    tile_bytes = (n_buf * tm * tk * x2d.dtype.itemsize
                  + n_buf * tk * tn * wt.dtype.itemsize
                  + 2 * tm * tn * jnp.dtype(out_dtype).itemsize
                  + (tm * tn * 4 if use_scratch else 0)
                  + 4 * 2 * tn * 4)
    vmem_limit = int(min(max(tile_bytes * 1.5 + (2 << 20), 32 << 20), 48 << 20))

    scratch_shapes = [pltpu.VMEM((tm, tn), jnp.float32)] if use_scratch else []

    out = pl.pallas_call(
        kernel,
        out_shape=jax.ShapeDtypeStruct((mp, npad), out_dtype),
        grid_spec=pltpu.PrefetchScalarGridSpec(
            num_scalar_prefetch=0,
            grid=grid,
            in_specs=[
                pl.BlockSpec((tm, tk), lambda i, j, k: (i, k), **stream_kw),  # x
                pl.BlockSpec((tk, tn), lambda i, j, k: (k, j), **stream_kw),  # W^T
                pl.BlockSpec((1, tn), lambda i, j, k: (0, j)),                # scale
                pl.BlockSpec((1, tn), lambda i, j, k: (0, j)),                # bias
            ],
            out_specs=pl.BlockSpec((tm, tn), lambda i, j, k: (i, j)),
            scratch_shapes=scratch_shapes,
        ),
        compiler_params=pltpu.CompilerParams(
            dimension_semantics=("parallel", "parallel", "arbitrary"),
            vmem_limit_bytes=vmem_limit),
    )(x2d, wt, scale, bias)

    return out[:M, :N].reshape(*orig_shape[:-1], N)


def lipschitz_linear(x, weight, bias, c, *, tm=None, tn=None, tk=None):
    """Convenience wrapper: prepare params (scale/W^T/pad) then apply."""
    prepared = prepare_lipschitz_linear(weight, bias, c, tn=tn, tk=tk)
    return lipschitz_linear_prepared(x, prepared, tm=tm)


# ----------------------------------------------------------------------------
# Init + reference + tests
# ----------------------------------------------------------------------------
def init_lipschitz_linear_params(key, in_features, out_features,
                                 dtype=jnp.float32):
    """Deterministic parameter init mirroring the PyTorch __init__ logic."""
    k_w, k_b = jax.random.split(key)
    bound_w = 1.0 / math.sqrt(in_features)   # init_fn stand-in (uniform-like)
    weight = jax.random.uniform(
        k_w, (out_features, in_features), dtype, minval=-bound_w, maxval=bound_w)
    stdv = 1.0 / math.sqrt(in_features)
    bias = jax.random.uniform(
        k_b, (out_features,), dtype, minval=-stdv, maxval=stdv)
    c = jnp.max(jnp.sum(jnp.abs(weight.astype(jnp.float32)), axis=1))
    c = c.reshape(1).astype(dtype)
    return weight, bias, c


def _reference(x2d, weight, bias, c):
    w = weight.astype(jnp.float32)
    lipc = jax.nn.softplus(c.astype(jnp.float32)[0])
    scale = jnp.minimum(lipc / jnp.sum(jnp.abs(w), axis=1), 1.0)
    w_scaled = w * scale[:, None]
    return (jnp.dot(x2d.astype(jnp.float32), w_scaled.T,
                    precision=jax.lax.Precision.HIGHEST)
            + bias.astype(jnp.float32))


if __name__ == "__main__":
    key = jax.random.PRNGKey(0)
    k_x1, k_p1, k_x2, k_p2, k_x3, k_p3 = jax.random.split(key, 6)
    batch, seq = 2, 8

    # Test 1: toy shapes, f32, single grid tile, accumulate-in-output path.
    in1, out1 = 32, 32
    x1 = jax.random.normal(k_x1, (batch, seq, in1), jnp.float32)
    w1, b1, c1 = init_lipschitz_linear_params(k_p1, in1, out1)
    y1 = jax.block_until_ready(lipschitz_linear(x1, w1, b1, c1))
    y1_ref = _reference(x1.reshape(-1, in1), w1, b1, c1).reshape(batch, seq, out1)
    assert y1.shape == (batch, seq, out1)
    assert jnp.allclose(y1, y1_ref, atol=1e-4, rtol=1e-4), "mismatch (test 1)"

    # Test 2: f32, forced tiny tiles -> full (1, 3, 2) grid with K accumulation,
    # prepared-params path, and the deep (Buffered(3)) input pipeline.
    in2, out2 = 256, 384
    x2 = jax.random.normal(k_x2, (batch, seq, in2), jnp.float32)
    w2, b2, c2 = init_lipschitz_linear_params(k_p2, in2, out2)
    prep2 = prepare_lipschitz_linear(w2, b2, c2, tn=128, tk=128)
    y2 = jax.block_until_ready(lipschitz_linear_prepared(x2, prep2, tm=16))
    y2_ref = _reference(x2.reshape(-1, in2), w2, b2, c2).reshape(batch, seq, out2)
    assert y2.shape == (batch, seq, out2)
    assert jnp.allclose(y2, y2_ref, atol=1e-4, rtol=1e-4), "mismatch (test 2)"

    # Test 3: bf16 operands + bf16 output -> f32 scratch accumulator path,
    # multi-M / multi-N / multi-K grid, auto tn split into two lane-dense blocks.
    in3, out3 = 256, 256
    x3 = jax.random.normal(k_x3, (batch, seq, in3), jnp.float32).astype(jnp.bfloat16)
    w3, b3, c3 = init_lipschitz_linear_params(k_p3, in3, out3, dtype=jnp.bfloat16)
    y3 = jax.block_until_ready(lipschitz_linear(x3, w3, b3, c3, tm=8, tk=128))
    y3_ref = _reference(x3.reshape(-1, in3), w3, b3, c3).reshape(batch, seq, out3)
    assert y3.shape == (batch, seq, out3)
    assert jnp.allclose(y3.astype(jnp.float32), y3_ref, atol=5e-2, rtol=5e-2), \
        "mismatch (test 3)"

    print("KERNEL_OK")
</pallas_src>

<mosaic_0001>
module attributes {stable_mosaic.version = 11 : i64} {
  func.func @kernel(%arg0: i32, %arg1: i32, %arg2: i32, %arg3: memref<16x128xf32, #tpu.memory_space<vmem>>, %arg4: memref<128x128xf32, #tpu.memory_space<vmem>>, %arg5: memref<1x128xf32, #tpu.memory_space<vmem>>, %arg6: memref<1x128xf32, #tpu.memory_space<vmem>>, %arg7: memref<16x128xf32, #tpu.memory_space<vmem>>) attributes {dimension_semantics = [#tpu.dimension_semantics<parallel>, #tpu.dimension_semantics<parallel>, #tpu.dimension_semantics<arbitrary>], iteration_bounds = array<i64: 1, 1, 1>, scalar_prefetch = 0 : i64, scratch_operands = 0 : i64, tpu.core_type = #tpu.core_type<tc>, window_params = [{transform_indices = @transform_0, window_bounds = array<i64: 16, 128>}, {transform_indices = @transform_1, window_bounds = array<i64: 128, 128>}, {transform_indices = @transform_2, window_bounds = array<i64: 1, 128>}, {transform_indices = @transform_3, window_bounds = array<i64: 1, 128>}, {transform_indices = @transform_4, window_bounds = array<i64: 16, 128>}]} {
    %c0_i32 = arith.constant 0 : i32
    %0 = arith.cmpi eq, %arg2, %c0_i32 : i32
    %1 = arith.extui %0 : i1 to i32
    %c0_i32_0 = arith.constant 0 : i32
    %2 = arith.cmpi ne, %1, %c0_i32_0 : i32
    scf.if %2 {
      %cst_10 = arith.constant 0.000000e+00 : f32
      %12 = vector.broadcast %cst_10 : f32 to vector<16x128xf32>
      %c0_11 = arith.constant 0 : index
      %c0_12 = arith.constant 0 : index
      %13 = vector.load %arg7[%c0_11, %c0_12] : memref<16x128xf32, #tpu.memory_space<vmem>>, vector<16x128xf32>
      tpu.vector_store %arg7[%c0_11, %c0_12], %12 {strides = array<i32>} : memref<16x128xf32, #tpu.memory_space<vmem>>, vector<16x128xf32>,
    } else {
    }
    %c0 = arith.constant 0 : index
    %c0_1 = arith.constant 0 : index
    %3 = vector.load %arg7[%c0, %c0_1] : memref<16x128xf32, #tpu.memory_space<vmem>>, vector<16x128xf32>
    %c0_2 = arith.constant 0 : index
    %c0_3 = arith.constant 0 : index
    %4 = vector.load %arg3[%c0_2, %c0_3] : memref<16x128xf32, #tpu.memory_space<vmem>>, vector<16x128xf32>
    %c0_4 = arith.constant 0 : index
    %c0_5 = arith.constant 0 : index
    %5 = vector.load %arg4[%c0_4, %c0_5] : memref<128x128xf32, #tpu.memory_space<vmem>>, vector<128x128xf32>
    %cst = arith.constant dense<0.000000e+00> : vector<16x128xf32>
    %6 = tpu.matmul %4, %5, %cst {dimension_numbers = #tpu.dot_dimension_numbers<[1], [0], [0], [1], [0, 0, 1, 1], [], []>, precision = #tpu.contract_precision<fp32>} : vector<16x128xf32>, vector<128x128xf32>, vector<16x128xf32> -> vector<16x128xf32>
    %7 = arith.addf %3, %6 : vector<16x128xf32>
    %c0_6 = arith.constant 0 : index
    %c0_7 = arith.constant 0 : index
    %8 = vector.load %arg7[%c0_6, %c0_7] : memref<16x128xf32, #tpu.memory_space<vmem>>, vector<16x128xf32>
    tpu.vector_store %arg7[%c0_6, %c0_7], %7 {strides = array<i32>} : memref<16x128xf32, #tpu.memory_space<vmem>>, vector<16x128xf32>,
    %c0_i32_8 = arith.constant 0 : i32
    %9 = arith.cmpi eq, %arg2, %c0_i32_8 : i32
    %10 = arith.extui %9 : i1 to i32
    %c0_i32_9 = arith.constant 0 : i32
    %11 = arith.cmpi ne, %10, %c0_i32_9 : i32
    scf.if %11 {
      %c0_10 = arith.constant 0 : index
      %c0_11 = arith.constant 0 : index
      %12 = vector.load %arg7[%c0_10, %c0_11] : memref<16x128xf32, #tpu.memory_space<vmem>>, vector<16x128xf32>
      %c0_12 = arith.constant 0 : index
      %c0_13 = arith.constant 0 : index
      %13 = vector.load %arg5[%c0_12, %c0_13] : memref<1x128xf32, #tpu.memory_space<vmem>>, vector<1x128xf32>
      %14 = vector.broadcast %13 : vector<1x128xf32> to vector<16x128xf32>
      %15 = arith.mulf %12, %14 : vector<16x128xf32>
      %c0_14 = arith.constant 0 : index
      %c0_15 = arith.constant 0 : index
      %16 = vector.load %arg6[%c0_14, %c0_15] : memref<1x128xf32, #tpu.memory_space<vmem>>, vector<1x128xf32>
      %17 = vector.broadcast %16 : vector<1x128xf32> to vector<16x128xf32>
      %18 = arith.addf %15, %17 : vector<16x128xf32>
      %c0_16 = arith.constant 0 : index
      %c0_17 = arith.constant 0 : index
      %19 = vector.load %arg7[%c0_16, %c0_17] : memref<16x128xf32, #tpu.memory_space<vmem>>, vector<16x128xf32>
      tpu.vector_store %arg7[%c0_16, %c0_17], %18 {strides = array<i32>} : memref<16x128xf32, #tpu.memory_space<vmem>>, vector<16x128xf32>,
    } else {
    }
    return
  }
  func.func @transform_0(%arg0: i32, %arg1: i32, %arg2: i32) -> (i32, i32) {
    %c0_i32 = arith.constant 0 : i32
    return %arg0, %arg2 : i32, i32
  }
  func.func @transform_1(%arg0: i32, %arg1: i32, %arg2: i32) -> (i32, i32) {
    %c0_i32 = arith.constant 0 : i32
    return %arg2, %arg1 : i32, i32
  }
  func.func @transform_2(%arg0: i32, %arg1: i32, %arg2: i32) -> (i32, i32) {
    %c0_i32 = arith.constant 0 : i32
    %c0_i32_0 = arith.constant 0 : i32
    return %c0_i32, %arg1 : i32, i32
  }
  func.func @transform_3(%arg0: i32, %arg1: i32, %arg2: i32) -> (i32, i32) {
    %c0_i32 = arith.constant 0 : i32
    %c0_i32_0 = arith.constant 0 : i32
    return %c0_i32, %arg1 : i32, i32
  }
  func.func @transform_4(%arg0: i32, %arg1: i32, %arg2: i32) -> (i32, i32) {
    %c0_i32 = arith.constant 0 : i32
    return %arg0, %arg1 : i32, i32
  }
}

</mosaic_0001>

<bundles_post_ra>
// kernel: tpu_custom_call.1
= control target key start
LH: loop header
LB: loop body
LE: loop exit
PB: predicated region body
PF: predicated region fallthrough
CT: control target
= control target key end

     0   :  { %9 = vsyncpa [#allocation3], 0  ;;  %s1750_s0 = inlined_call_operand.hbm [shape: f32[16,128], index: 0, kind: input, shape index: {}]   ;;  %s1751_s1 = inlined_call_operand.hbm [shape: f32[128,128], index: 1, kind: input, shape index: {}]   ;;  %s1752_s2 = inlined_call_operand.vmem [shape: f32[1,128], index: 2, kind: input, shape index: {}]   ;;  %s1753_s3 = inlined_call_operand.vmem [shape: f32[1,128], index: 3, kind: input, shape index: {}]   ;;  %s1754_s4 = inlined_call_operand.hbm [shape: f32[16,128], index: 4, kind: output, shape index: {}]  }
   0x1   :  { %10 = vsyncpa [#allocation6], 0 }
   0x2   :  { %11 = vsyncpa [#allocation4], 0  ;;  %s1403_s15 = smov [#allocation2]   ;;  %s1331_s19 = scalar_lea.hbm %s1750_s0, 256 }
   0x3   :  { %s17_s16 = sshll.u32 %s1403_s15, 4  ;;  %p1332_p0 = scmp.ne.s32.totalorder %s1750_s0, %s1331_s19  ;;  %s18_s16 = int_to_ptr.vmem [resolvable:$true] %s17_s16 }
   0x4   :  { %p1335_p1 = scmp.lt.u32.totalorder %s1331_s19, %s1750_s0 }
   0x6   :  { %p1337_p2 = pnand %p1335_p1, %p1332_p0 }
   0x8   :  { %1340 = shalt.err (!%p1337_p2)
}
   0x9   :  { %s1341_s24 = scalar_lea.vmem %s18_s16, 256  ;;  %p1346_p4 = scmp.lt.s32.totalorder %s18_s16, %s18_s16 }
   0xa   :  { %p1342_p3 = scmp.ne.s32.totalorder %s18_s16, %s1341_s24  ;;  %p1347_p5 = scmp.lt.s32.totalorder %s1341_s24, %s1341_s24 }
   0xc   :  { %p1348_p6 = por %p1347_p5, %p1346_p4 }
   0xe   :  { %p1349_p7 = pnand %p1348_p6, %p1342_p3 }
  0x10   :  { %1352 = shalt.err (!%p1349_p7)
}
  0x11   :  { %s1404_s25 = smov 128   ;;  %s1405_s26 = smov 8  }
  0x12   :  { %23 = dma.hbm_to_vmem [thread:$0]  %s1750_s0, 256, %s18_s16, [#allocation3], %s1404_s25, %s1404_s25, %s1405_s26  }
  0x13   :  { %s1406_s29 = smov [#allocation5]   ;;  %s1353_s7 = scalar_lea.hbm %s1751_s1, 2048 }
  0x14   :  { %s29_s30 = sshll.u32 %s1406_s29, 4  ;;  %p1354_p8 = scmp.ne.s32.totalorder %s1751_s1, %s1353_s7  ;;  %s30_s30 = int_to_ptr.vmem [resolvable:$true] %s29_s30 }
  0x15   :  { %p1357_p9 = scmp.lt.u32.totalorder %s1353_s7, %s1751_s1 }
  0x17   :  { %p1359_p10 = pnand %p1357_p9, %p1354_p8 }
  0x19   :  { %1362 = shalt.err (!%p1359_p10)
}
  0x1a   :  { %s1363_s12 = scalar_lea.vmem %s30_s30, 2048  ;;  %p1368_p12 = scmp.lt.s32.totalorder %s30_s30, %s30_s30 }
  0x1b   :  { %p1364_p11 = scmp.ne.s32.totalorder %s30_s30, %s1363_s12  ;;  %p1369_p13 = scmp.lt.s32.totalorder %s1363_s12, %s1363_s12 }
  0x1d   :  { %p1370_p0 = por %p1369_p13, %p1368_p12 }
  0x1f   :  { %p1371_p1 = pnand %p1370_p0, %p1364_p11 }
  0x21   :  { %1374 = shalt.err (!%p1371_p1)
}
  0x22   :  { %35 = dma.hbm_to_vmem [thread:$0]  %s1751_s1, 2048, %s30_s30, [#allocation6], %s1404_s25, %s1404_s25, %s1405_s26  }
  0x23   :  { %1397 = dma.done.wait [#allocation3], 256  }
  0x24   :  { %1398 = vsyncadd [#allocation3], 4294967040 }
  0x25   :  { %1399 = dma.done.wait [#allocation6], 2048  }
  0x26   :  { %1400 = vsyncadd [#allocation6], 4294965248  ;;  %v56_v0 = vld [vmem:[#allocation5] sm:$0xff]  ;;  %v57_v1 = vld [vmem:[#allocation5 + $0x8] sm:$0xff]  ;;  %s1407_s17 = smov [#allocation7]  }
  0x27   :  { %v58_v2 = vld [vmem:[#allocation5 + $0x10] sm:$0xff]  ;;  %v73_v3 = vand.u32 4294901760, %v56_v0  ;;  %v76_v4 = vand.u32 4294901760, %v57_v1  ;;  %v1463_v5 = vld [vmem:[#allocation5 + $0x18] sm:$0xff]  ;;  %v1465_v7 = vld [vmem:[#allocation5 + $0x20] sm:$0xff]  ;;  %s790_s18 = sshll.u32 %s1407_s17, 4  ;;  %s791_s18 = int_to_ptr.vmem [resolvable:$true] %s790_s18 }
  0x28   :  { %v79_v6 = vand.u32 4294901760, %v58_v2  ;;  %v1467_v8 = vld [vmem:[#allocation5 + $0x28] sm:$0xff]  ;;  %v82_v9 = vand.u32 4294901760, %v1463_v5  ;;  %v85_v11 = vand.u32 4294901760, %v1465_v7  ;;  %v1476_v14 = vld [vmem:[#allocation5 + $0x30] sm:$0xff]  ;;  %v1478_v15 = vld [vmem:[#allocation5 + $0x38] sm:$0xff]  ;;  %p1380_p3 = scmp.lt.s32.totalorder %s791_s18, %s791_s18 }
  0x29   :  { %v1470_v10 = vpack.c.bf16 %v76_v4, %v73_v3  ;;  %v88_v12 = vand.u32 4294901760, %v1467_v8  ;;  %v54_v16 = vld [vmem:[#allocation2] sm:$0xff]  ;;  %v91_v19 = vand.u32 4294901760, %v1476_v14  ;;  %v94_v20 = vand.u32 4294901760, %v1478_v15  ;;  %v1496_v21 = vld [vmem:[#allocation5 + $0x40] sm:$0xff]  ;;  %v1498_v22 = vld [vmem:[#allocation5 + $0x48] sm:$0xff] }
  0x2a   :  { %v1474_v13 = vpack.c.bf16 %v82_v9, %v79_v6  ;;  %v1484_v17 = vand.u32 4294901760, %v54_v16  ;;  %v97_v26 = vand.u32 4294901760, %v1496_v21  ;;  %v100_v27 = vand.u32 4294901760, %v1498_v22  ;;  %v1516_v28 = vld [vmem:[#allocation5 + $0x50] sm:$0xff]  ;;  %v1518_v29 = vld [vmem:[#allocation5 + $0x58] sm:$0xff]  ;;  %v1533_v36 = vld [vmem:[#allocation5 + $0x60] sm:$0xff] }
  0x2b   :  { %1124 = vmatprep.subr.bf16.mxu1 %v1470_v10  ;;  %1220 = vmatprep.subr.bf16.mxu0 %v1470_v10  ;;  %v1492_v18 = vpack.c.bf16 %v88_v12, %v85_v11  ;;  %v1512_v25 = vpack.c.bf16 %v94_v20, %v91_v19  ;;  %v103_v31 = vand.u32 4294901760, %v1516_v28  ;;  %v55_v33 = vld [vmem:[#allocation2 + $0x8] sm:$0xff]  ;;  %v106_v35 = vand.u32 4294901760, %v1518_v29  ;;  %v1535_v37 = vld [vmem:[#allocation5 + $0x68] sm:$0xff]  ;;  %v1547_v43 = vld [vmem:[#allocation5 + $0x70] sm:$0xff]  ;;  %s1375_s19 = scalar_lea.vmem %s791_s18, 256 }
  0x2c   :  { %1126 = vmatpush3.bf16.msra.mxu1 %v1470_v10  ;;  %1222 = vmatpush3.bf16.msra.mxu0 %v1470_v10  ;;  %v1501_v23 = vsub.f32 %v54_v16, %v1484_v17  ;;  %v1530_v34 = vpack.c.bf16 %v100_v27, %v97_v26  ;;  %v1537_v38 = vsub.f32 %v56_v0, %v73_v3  ;;  %v1541_v40 = vand.u32 4294901760, %v55_v33  ;;  %v1549_v44 = vld [vmem:[#allocation5 + $0x78] sm:$0xff]  ;;  %p1376_p2 = scmp.ne.s32.totalorder %s791_s18, %s1375_s19  ;;  %p1381_p4 = scmp.lt.s32.totalorder %s1375_s19, %s1375_s19 }
  0x2d   :  { %1128 = vmatprep.subr.bf16.mxu1 %v1474_v13  ;;  %1224 = vmatprep.subr.bf16.mxu0 %v1474_v13  ;;  %v1539_v39 = vsub.f32 %v57_v1, %v76_v4  ;;  %v109_v41 = vand.u32 4294901760, %v1533_v36  ;;  %v112_v42 = vand.u32 4294901760, %v1535_v37  ;;  %v1551_v45 = vsub.f32 %v58_v2, %v79_v6 }
  0x2e   :  { %v155_v24 = vand.u32 4294901760, %v1501_v23  ;;  %v1559_v46 = vpack.c.bf16 %v106_v35, %v103_v31  ;;  %v176_v47 = vand.u32 4294901760, %v1537_v38  ;;  %v1564_v49 = vsub.f32 %v1463_v5, %v82_v9  ;;  %p1382_p5 = por %p1381_p4, %p1380_p3 }
  0x2f   :  { %v183_v48 = vand.u32 4294901760, %v1539_v39  ;;  %v115_v50 = vand.u32 4294901760, %v1547_v43  ;;  %v118_v51 = vand.u32 4294901760, %v1549_v44  ;;  %v1569_v52 = vsub.f32 %v55_v33, %v1541_v40 }
  0x30   :  { %1130 = vmatpush3.bf16.msra.mxu1 %v1474_v13  ;;  %1226 = vmatpush3.bf16.msra.mxu0 %v1474_v13  ;;  %v156_v30 = vsub.f32 %v1501_v23, %v155_v24  ;;  %v1577_v53 = vpack.c.bf16 %v112_v42, %v109_v41  ;;  %v190_v54 = vand.u32 4294901760, %v1551_v45  ;;  %v1583_v55 = vsub.f32 %v1465_v7, %v85_v11  ;;  %p1383_p6 = pnand %p1382_p5, %p1376_p2 }
  0x31   :  { %1132 = vmatprep.subr.bf16.mxu1 %v1492_v18  ;;  %1228 = vmatprep.subr.bf16.mxu0 %v1492_v18  ;;  %v177_v56 = vsub.f32 %v1537_v38, %v176_v47  ;;  %v184_v57 = vsub.f32 %v1539_v39, %v183_v48  ;;  %v197_v58 = vand.u32 4294901760, %v1564_v49  ;;  %v1593_v59 = vsub.f32 %v1467_v8, %v88_v12 }
  0x32   :  { %1050 = vmatprep.mubr.f32.mxu0 %v155_v24  ;;  %v157_v32 = vand.u32 4294901760, %v156_v30  ;;  %v1599_v60 = vpack.c.bf16 %v118_v51, %v115_v50  ;;  %v165_v61 = vand.u32 4294901760, %v1569_v52  ;;  %v191_v62 = vsub.f32 %v1551_v45, %v190_v54 }
  0x33   :  { %v204_v63 = vand.u32 4294901760, %v1583_v55  ;;  %v1609_v0 = vsub.f32 %v1476_v14, %v91_v19  ;;  %v1614_v1 = vsub.f32 %v1478_v15, %v94_v20  ;;  %v178_v2 = vand.u32 4294901760, %v177_v56 }
  0x34   :  { %1134 = vmatpush3.bf16.msra.mxu1 %v1492_v18  ;;  %1230 = vmatpush3.bf16.msra.mxu0 %v1492_v18  ;;  %v185_v3 = vand.u32 4294901760, %v184_v57  ;;  %v198_v4 = vsub.f32 %v1564_v49, %v197_v58  ;;  %v211_v5 = vand.u32 4294901760, %v1593_v59  ;;  %v1251_v6 = vpack.c.bf16 %v183_v48, %v176_v47 }
  0x35   :  { %1136 = vmatprep.subr.bf16.mxu1 %v1512_v25  ;;  %1232 = vmatprep.subr.bf16.mxu0 %v1512_v25  ;;  %v166_v7 = vsub.f32 %v1569_v52, %v165_v61  ;;  %v1624_v8 = vsub.f32 %v1496_v21, %v97_v26  ;;  %v192_v9 = vand.u32 4294901760, %v191_v62  ;;  %v205_v11 = vsub.f32 %v1583_v55, %v204_v63 }
  0x36   :  { %945 = vmatprep.mubr.f32.mxu1 %v157_v32  ;;  %v218_v12 = vand.u32 4294901760, %v1609_v0  ;;  %v225_v14 = vand.u32 4294901760, %v1614_v1  ;;  %v1155_v15 = vpack.c.bf16 %v185_v3, %v178_v2  ;;  %v199_v16 = vand.u32 4294901760, %v198_v4 }
  0x37   :  { %v212_v19 = vsub.f32 %v1593_v59, %v211_v5  ;;  %v1637_v20 = vsub.f32 %v1498_v22, %v100_v27  ;;  %v167_v21 = vand.u32 4294901760, %v166_v7  ;;  %v1255_v24 = vpack.c.bf16 %v197_v58, %v190_v54 }
  0x38   :  { %1138 = vmatpush3.bf16.msra.mxu1 %v1512_v25  ;;  %1234 = vmatpush3.bf16.msra.mxu0 %v1512_v25  ;;  %v232_v26 = vand.u32 4294901760, %v1624_v8  ;;  %v1643_v30 = vsub.f32 %v1516_v28, %v103_v31  ;;  %v219_v32 = vsub.f32 %v1609_v0, %v218_v12  ;;  %v226_v33 = vsub.f32 %v1614_v1, %v225_v14 }
  0x39   :  { %1140 = vmatprep.subr.bf16.mxu1 %v1530_v34  ;;  %1236 = vmatprep.subr.bf16.mxu0 %v1530_v34  ;;  %v1652_v22 = vsub.f32 %v1518_v29, %v106_v35  ;;  %v1159_v27 = vpack.c.bf16 %v199_v16, %v192_v9  ;;  %v206_v47 = vand.u32 4294901760, %v205_v11  ;;  %v213_v48 = vand.u32 4294901760, %v212_v19 }
  0x3a   :  { %v239_v28 = vand.u32 4294901760, %v1637_v20  ;;  %v1259_v31 = vpack.c.bf16 %v211_v5, %v204_v63  ;;  %v233_v54 = vsub.f32 %v1624_v8, %v232_v26  ;;  %v1659_v56 = vsub.f32 %v1533_v36, %v109_v41 }
  0x3b   :  { %v220_v29 = vand.u32 4294901760, %v219_v32  ;;  %v227_v35 = vand.u32 4294901760, %v226_v33  ;;  %v246_v57 = vand.u32 4294901760, %v1643_v30  ;;  %v253_v58 = vand.u32 4294901760, %v1652_v22 }
  0x3c   :  { %1142 = vmatpush3.bf16.msra.mxu1 %v1530_v34  ;;  %1238 = vmatpush3.bf16.msra.mxu0 %v1530_v34  ;;  %v1163_v62 = vpack.c.bf16 %v213_v48, %v206_v47  ;;  %v1667_v63 = vsub.f32 %v1535_v37, %v112_v42  ;;  %v1263_v36 = vpack.c.bf16 %v225_v14, %v218_v12  ;;  %v234_v41 = vand.u32 4294901760, %v233_v54 }
  0x3d   :  { %1144 = vmatprep.subr.bf16.mxu1 %v1559_v46  ;;  %1240 = vmatprep.subr.bf16.mxu0 %v1559_v46  ;;  %v1167_v2 = vpack.c.bf16 %v227_v35, %v220_v29  ;;  %v247_v3 = vsub.f32 %v1643_v30, %v246_v57  ;;  %v254_v4 = vsub.f32 %v1652_v22, %v253_v58  ;;  %v260_v5 = vand.u32 4294901760, %v1659_v56 }
  0x3e   :  { %v267_v37 = vand.u32 4294901760, %v1667_v63  ;;  %v1678_v42 = vsub.f32 %v1547_v43, %v115_v50  ;;  %v1683_v7 = vsub.f32 %v1549_v44, %v118_v51  ;;  %v1267_v9 = vpack.c.bf16 %v239_v28, %v232_v26 }
  0x3f   :  { %v248_v11 = vand.u32 4294901760, %v247_v3  ;;  %v255_v12 = vand.u32 4294901760, %v254_v4  ;;  %v261_v14 = vsub.f32 %v1659_v56, %v260_v5  ;;  %v1271_v51 = vpack.c.bf16 %v253_v58, %v246_v57 }
  0x40   :  { %1146 = vmatpush3.bf16.msra.mxu1 %v1559_v46  ;;  %1242 = vmatpush3.bf16.msra.mxu0 %v1559_v46  ;;  %v268_v16 = vsub.f32 %v1667_v63, %v267_v37  ;;  %v274_v43 = vand.u32 4294901760, %v1678_v42  ;;  %v281_v50 = vand.u32 4294901760, %v1683_v7  ;;  %v1275_v33 = vpack.c.bf16 %v267_v37, %v260_v5 }
  0x41   :  { %1148 = vmatprep.subr.bf16.mxu1 %v1577_v53  ;;  %1244 = vmatprep.subr.bf16.mxu0 %v1577_v53  ;;  %v1175_v44 = vpack.c.bf16 %v255_v12, %v248_v11  ;;  %v262_v19 = vand.u32 4294901760, %v261_v14  ;;  %v1191_v54 = vpack.c.bf16 %v1564_v49, %v1551_v45 }
  0x42   :  { %v282_v26 = vsub.f32 %v1683_v7, %v281_v50 }
  0x44   :  { %1150 = vmatpush3.bf16.msra.mxu1 %v1577_v53  ;;  %1246 = vmatpush3.bf16.msra.mxu0 %v1577_v53  ;;  %v283_v47 = vand.u32 4294901760, %v282_v26 }
  0x45   :  { %1152 = vmatprep.subr.bf16.mxu1 %v1599_v60  ;;  %1248 = vmatprep.subr.bf16.mxu0 %v1599_v60 }
  0x48   :  { %1154 = vmatpush3.bf16.msra.mxu1 %v1599_v60  ;;  %1250 = vmatpush3.bf16.msra.mxu0 %v1599_v60 }
  0x49   :  { %1156 = vmatprep.subr.bf16.mxu1 %v1155_v15  ;;  %1252 = vmatprep.subr.bf16.mxu0 %v1251_v6 }
  0x4b   :  { %946 = vmatmul.mubr.f32.vlgmr.msra.gmra.mrb[0].mxu1 %v167_v21  ;;  %1051 = vmatmul.mubr.f32.vlgmr.msra.gmra.mrb[0].mxu0 %v165_v61  ;;  %v240_v61 = vsub.f32 %v1637_v20, %v239_v28  ;;  %v269_v21 = vand.u32 4294901760, %v268_v16  ;;  %v1279_v28 = vpack.c.bf16 %v281_v50, %v274_v43 }
  0x4c   :  { %1158 = vmatpush3.bf16.msra.mxu1 %v1155_v15  ;;  %1254 = vmatpush3.bf16.msra.mxu0 %v1251_v6 }
  0x4d   :  { %1160 = vmatprep.subr.bf16.mxu1 %v1159_v27  ;;  %1256 = vmatprep.subr.bf16.mxu0 %v1255_v24  ;;  %v241_v6 = vand.u32 4294901760, %v240_v61  ;;  %v1179_v32 = vpack.c.bf16 %v269_v21, %v262_v19 }
  0x4e   :  { %980 = vmatprep.mubr.f32.mxu1 %v1484_v17  ;;  %1085 = vmatprep.mubr.f32.mxu0 %v1484_v17 }
  0x4f   :  { %v1171_v15 = vpack.c.bf16 %v241_v6, %v234_v41 }
  0x50   :  { %1162 = vmatpush3.bf16.msra.mxu1 %v1159_v27  ;;  %1258 = vmatpush3.bf16.msra.mxu0 %v1255_v24  ;;  %v275_v24 = vsub.f32 %v1678_v42, %v274_v43 }
  0x51   :  { %1164 = vmatprep.subr.bf16.mxu1 %v1163_v62  ;;  %1260 = vmatprep.subr.bf16.mxu0 %v1259_v31 }
  0x52   :  { %v276_v27 = vand.u32 4294901760, %v275_v24 }
  0x54   :  { %1166 = vmatpush3.bf16.msra.mxu1 %v1163_v62  ;;  %1262 = vmatpush3.bf16.msra.mxu0 %v1259_v31  ;;  %v1183_v48 = vpack.c.bf16 %v283_v47, %v276_v27  ;;  %v1187_v31 = vpack.c.bf16 %v1539_v39, %v1537_v38  ;;  %v1195_v38 = vpack.c.bf16 %v1593_v59, %v1583_v55  ;;  %v804_v55 = vld [vmem:[%s1753_s3] ss:$0 sm:$0xff] }
  0x55   :  { %1168 = vmatprep.subr.bf16.mxu1 %v1167_v2  ;;  %1264 = vmatprep.subr.bf16.mxu0 %v1263_v36  ;;  %v1199_v39 = vpack.c.bf16 %v1614_v1, %v1609_v0 }
  0x58   :  { %1170 = vmatpush3.bf16.msra.mxu1 %v1167_v2  ;;  %1266 = vmatpush3.bf16.msra.mxu0 %v1263_v36 }
  0x59   :  { %1172 = vmatprep.subr.bf16.mxu1 %v1171_v15  ;;  %1268 = vmatprep.subr.bf16.mxu0 %v1267_v9 }
  0x5c   :  { %1174 = vmatpush3.bf16.msra.mxu1 %v1171_v15  ;;  %1270 = vmatpush3.bf16.msra.mxu0 %v1267_v9 }
  0x5d   :  { %1176 = vmatprep.subr.bf16.mxu1 %v1175_v44  ;;  %1272 = vmatprep.subr.bf16.mxu0 %v1271_v51 }
  0x60   :  { %1178 = vmatpush3.bf16.msra.mxu1 %v1175_v44  ;;  %1274 = vmatpush3.bf16.msra.mxu0 %v1271_v51 }
  0x61   :  { %1180 = vmatprep.subr.bf16.mxu1 %v1179_v32  ;;  %1276 = vmatprep.subr.bf16.mxu0 %v1275_v33 }
  0x64   :  { %1182 = vmatpush3.bf16.msra.mxu1 %v1179_v32  ;;  %1278 = vmatpush3.bf16.msra.mxu0 %v1275_v33 }
  0x65   :  { %1184 = vmatprep.subr.bf16.mxu1 %v1183_v48  ;;  %1280 = vmatprep.subr.bf16.mxu0 %v1279_v28 }
  0x68   :  { %1186 = vmatpush3.bf16.msra.mxu1 %v1183_v48  ;;  %1282 = vmatpush3.bf16.msra.mxu0 %v1279_v28 }
  0x69   :  { %1188 = vmatprep.subr.bf16.mxu1 %v1187_v31  ;;  %1284 = vmatprep.subr.bf16.mxu0 %v1470_v10 }
  0x6b   :  { %981 = vmatmul.mubr.f32.vlgmr.msra.gmra.mrb[0].mxu1 %v1541_v40  ;;  %1086 = vmatmul.mubr.f32.vlgmr.msra.gmra.mrb[0].mxu0 %v1541_v40 }
  0x6c   :  { %1190 = vmatpush3.bf16.msra.mxu1 %v1187_v31  ;;  %1286 = vmatpush3.bf16.msra.mxu0 %v1470_v10  ;;  %v1203_v10 = vpack.c.bf16 %v1637_v20, %v1624_v8 }
  0x6d   :  { %1192 = vmatprep.subr.bf16.mxu1 %v1191_v54  ;;  %1288 = vmatprep.subr.bf16.mxu0 %v1474_v13 }
  0x6e   :  { %1015 = vmatprep.mubr.f32.mxu1 %v1501_v23  ;;  %1120 = vmatprep.mubr.f32.mxu0 %v1484_v17  ;;  %v1211_v17 = vpack.c.bf16 %v1667_v63, %v1659_v56 }
  0x70   :  { %1194 = vmatpush3.bf16.msra.mxu1 %v1191_v54  ;;  %1290 = vmatpush3.bf16.msra.mxu0 %v1474_v13  ;;  %v1207_v13 = vpack.c.bf16 %v1652_v22, %v1643_v30 }
  0x71   :  { %1196 = vmatprep.subr.bf16.mxu1 %v1195_v38  ;;  %1292 = vmatprep.subr.bf16.mxu0 %v1492_v18 }
  0x74   :  { %1198 = vmatpush3.bf16.msra.mxu1 %v1195_v38  ;;  %1294 = vmatpush3.bf16.msra.mxu0 %v1492_v18  ;;  %v1215_v18 = vpack.c.bf16 %v1683_v7, %v1678_v42 }
  0x75   :  { %1200 = vmatprep.subr.bf16.mxu1 %v1199_v39  ;;  %1296 = vmatprep.subr.bf16.mxu0 %v1512_v25 }
  0x78   :  { %1202 = vmatpush3.bf16.msra.mxu1 %v1199_v39  ;;  %1298 = vmatpush3.bf16.msra.mxu0 %v1512_v25 }
  0x79   :  { %1204 = vmatprep.subr.bf16.mxu1 %v1203_v10  ;;  %1300 = vmatprep.subr.bf16.mxu0 %v1530_v34 }
  0x7c   :  { %1206 = vmatpush3.bf16.msra.mxu1 %v1203_v10  ;;  %1302 = vmatpush3.bf16.msra.mxu0 %v1530_v34 }
  0x7d   :  { %1208 = vmatprep.subr.bf16.mxu1 %v1207_v13  ;;  %1304 = vmatprep.subr.bf16.mxu0 %v1559_v46 }
  0x80   :  { %1210 = vmatpush3.bf16.msra.mxu1 %v1207_v13  ;;  %1306 = vmatpush3.bf16.msra.mxu0 %v1559_v46 }
  0x81   :  { %1212 = vmatprep.subr.bf16.mxu1 %v1211_v17  ;;  %1308 = vmatprep.subr.bf16.mxu0 %v1577_v53 }
  0x84   :  { %1214 = vmatpush3.bf16.msra.mxu1 %v1211_v17  ;;  %1310 = vmatpush3.bf16.msra.mxu0 %v1577_v53  ;;  %v803_v53 = vld [vmem:[%s1752_s2] ss:$0 sm:$0xff] }
  0x85   :  { %1216 = vmatprep.subr.bf16.mxu1 %v1215_v18  ;;  %1312 = vmatprep.subr.bf16.mxu0 %v1599_v60 }
  0x88   :  { %1218 = vmatpush3.bf16.msra.mxu1 %v1215_v18  ;;  %1314 = vmatpush3.bf16.msra.mxu0 %v1599_v60 }
  0x8b   :  { %1016 = vmatmul.mubr.f32.vlgmr.msra.gmra.mrb[0].mxu1 %v1569_v52  ;;  %1121 = vmatmul.mubr.f32.vlgmr.msra.gmra.mrb[0].mxu0 %v1541_v40 }
 0x15e   :  { %v1017_v23 = vpop.f32.mrb[0].mxu1  ;;  %v1122_v25 = vpop.f32.mrb[0].mxu0 }
 0x15f   :  { %v1315_v34 = vadd.f32 %v1122_v25, %v1017_v23  ;;  %v430_v45 = vpop.f32.mrb[1].mxu1  ;;  %v746_v46 = vpop.f32.mrb[1].mxu0 }
 0x160   :  { %v1316_v49 = vadd.f32 %v746_v46, %v430_v45 }
 0x161   :  { %v773_v59 = vmul.f32 %v1315_v34, %v803_v53 }
 0x162   :  { %v772_v52 = vmul.f32 %v1316_v49, %v803_v53 }
 0x163   :  { %v782_v60 = vadd.f32 %v804_v55, %v773_v59 }
 0x164   :  { %v781_v40 = vadd.f32 %v804_v55, %v772_v52 }
 0x165   :  { %784 = vst [vmem:[#allocation7 + $0x8] sm:$0xff] %v782_v60 }
 0x166   :  { %783 = vst [vmem:[#allocation7] sm:$0xff] %v781_v40 }
 0x167   :  { %1386 = shalt.err (!%p1383_p6)
}
 0x168   :  { %s1387_s3 = scalar_lea.hbm %s1754_s4, 256 }
 0x169   :  { %p1388_p7 = scmp.ne.s32.totalorder %s1754_s4, %s1387_s3  ;;  %p1391_p8 = scmp.lt.u32.totalorder %s1387_s3, %s1754_s4 }
 0x16b   :  { %p1393_p9 = pnand %p1391_p8, %p1388_p7 }
 0x16d   :  { %1396 = shalt.err (!%p1393_p9)
}
 0x16e   :  { %796 = dma.vmem_to_hbm [thread:$0]  %s791_s18, 256, %s1754_s4, [#allocation4], %s1404_s25, %s1404_s25, %s1405_s26  }
 0x16f   :  { %1401 = dma.done.wait [#allocation4], 256  }
 0x170   :  { %1402 = vsyncadd [#allocation4], 4294967040 }
 0x171   :  { %800 = vsyncpa [#allocation3], 1 }
 0x172   :  { %801 = vsyncpa [#allocation6], 1 }
 0x173   :  { %802 = vsyncpa [#allocation4], 1 }

</bundles_post_ra>
